<compile_context>
chip_gen: v6e
topology: v6e:2x2x1
jax: 0.10.0
libtpu: 0.0.40
codegen_flags: <defaults>
</compile_context>

<pallas_src>
import functools

import jax
import jax.numpy as jnp
from jax.experimental import pallas as pl
from jax.experimental.pallas import tpu as pltpu


def _round_up(x, m):
    return (x + m - 1) // m * m


def _gat_fused_kernel(x_ref, g_ref, wh_ref, bh_ref, wo_ref, bo_ref, o_ref,
                      *, n_heads, hid_pad):
    """One batch element: multi-head GAT -> LeakyReLU -> output GAT -> LeakyReLU."""
    x = x_ref[0]                               # (N, in_c)
    g = g_ref[...]                             # (N, N)
    neg_inf = jnp.float32(-1e16)

    def masked_softmax_attend(h):
        # s = (h @ h^T) * graph ; s[s == 0] = -1e16 ; att = softmax(s, -1) ; att @ h
        s = jax.lax.dot_general(h, h, (((1,), (1,)), ((), ())),
                                preferred_element_type=jnp.float32)    # (N, N)
        s = s * g
        s = jnp.where(s == 0.0, neg_inf, s)                            # masked_fill_
        s_max = jnp.max(s, axis=-1, keepdims=True)
        e = jnp.exp(s - s_max)
        denom = jnp.sum(e, axis=-1, keepdims=True)
        att = e * pl.reciprocal(denom, approx=True)
        return jnp.dot(att, h, preferred_element_type=jnp.float32)

    # All heads' linear projections in a single MXU call:
    # (N, in_c) @ (in_c, n_heads*hid_pad) -> heads live lane-tile-aligned.
    h_all = jnp.dot(x, wh_ref[...], preferred_element_type=jnp.float32)

    n = x.shape[0]
    out_pad = o_ref.shape[-1]

    # Output-layer projection accumulated per head (== concat + single matmul,
    # but with only lane-aligned slices and no in-kernel concatenate).
    h2 = jnp.zeros((n, out_pad), jnp.float32)
    for hd in range(n_heads):
        lo = hd * hid_pad
        h_hd = h_all[:, lo:lo + hid_pad]                               # lane-aligned
        a = masked_softmax_attend(h_hd) + bh_ref[:, lo:lo + hid_pad]
        a = jnp.where(a >= 0.0, a, 0.01 * a)                           # LeakyReLU
        h2 = h2 + jnp.dot(a, wo_ref[lo:lo + hid_pad, :],
                          preferred_element_type=jnp.float32)

    # Output GraphAttentionLayer (out_c lane-padded with zero weight columns,
    # so scores / attention are identical to the unpadded layer).
    y = masked_softmax_attend(h2) + bo_ref[...]
    y = jnp.where(y >= 0.0, y, 0.01 * y)                               # LeakyReLU
    o_ref[0] = y


def gat_subnet(x, graph, w_heads_t, b_heads, w_out_t, b_out, *, n_heads, hid_pad):
    """Fused GATSubNet forward.  x: (B, N, in_c) f32 -> (B, N, out_pad) f32."""
    B, N, in_c = x.shape
    hid_all = n_heads * hid_pad
    out_pad = w_out_t.shape[1]

    kernel = functools.partial(_gat_fused_kernel, n_heads=n_heads, hid_pad=hid_pad)
    return pl.pallas_call(
        kernel,
        out_shape=jax.ShapeDtypeStruct((B, N, out_pad), jnp.float32),
        grid=(B,),
        in_specs=[
            pl.BlockSpec((1, N, in_c), lambda b: (b, 0, 0)),      # x (per batch element)
            pl.BlockSpec((N, N), lambda b: (0, 0)),               # graph (shared)
            pl.BlockSpec((in_c, hid_all), lambda b: (0, 0)),      # all-head W^T (head-padded)
            pl.BlockSpec((1, hid_all), lambda b: (0, 0)),         # all-head bias (head-padded)
            pl.BlockSpec((hid_all, out_pad), lambda b: (0, 0)),   # W_out^T (lane-padded)
            pl.BlockSpec((1, out_pad), lambda b: (0, 0)),         # b_out (lane-padded)
        ],
        out_specs=pl.BlockSpec((1, N, out_pad), lambda b: (b, 0, 0)),
        compiler_params=pltpu.CompilerParams(
            dimension_semantics=("parallel",)),
    )(x, graph, w_heads_t, b_heads, w_out_t, b_out)


def init_gat_params(key, in_c, hid_c, out_c, n_heads):
    """Deterministic normal(0,1) init, matching nn.init.normal_ in the module."""
    keys = jax.random.split(key, 2 * n_heads + 2)
    params = {"heads": []}
    for h in range(n_heads):
        W = jax.random.normal(keys[2 * h], (hid_c, in_c), dtype=jnp.float32)
        b = jax.random.normal(keys[2 * h + 1], (hid_c,), dtype=jnp.float32)
        params["heads"].append((W, b))
    params["W_out"] = jax.random.normal(keys[-2], (out_c, hid_c * n_heads),
                                        dtype=jnp.float32)
    params["b_out"] = jax.random.normal(keys[-1], (out_c,), dtype=jnp.float32)
    return params


def gat_net_forward(flow_x, graph, params):
    """GATNet.forward: flow_x (B, N, T, C), graph (N, N) -> (B, N, 1, out_c)."""
    B, N = flow_x.shape[0], flow_x.shape[1]
    x = flow_x.reshape(B, N, -1).astype(jnp.float32)          # flow.view(B, N, -1)
    in_c = x.shape[-1]

    n_heads = len(params["heads"])
    hid_c = params["heads"][0][0].shape[0]
    out_c = params["W_out"].shape[0]
    hid_pad = _round_up(hid_c, 128)                           # lane-aligned per-head width
    out_pad = _round_up(out_c, 128)                           # lane-dense output stores

    # Per-head weights, pre-transposed, each head zero-padded to a lane tile so
    # every in-kernel head slice is lane-aligned.  Zero padding keeps the math
    # identical to the unpadded layers.
    w_heads_t = jnp.zeros((in_c, n_heads * hid_pad), jnp.float32)
    b_heads = jnp.zeros((1, n_heads * hid_pad), jnp.float32)
    w_out_t = jnp.zeros((n_heads * hid_pad, out_pad), jnp.float32)
    for hd, (W, b) in enumerate(params["heads"]):
        lo = hd * hid_pad
        w_heads_t = w_heads_t.at[:, lo:lo + hid_c].set(W.T)
        b_heads = b_heads.at[0, lo:lo + hid_c].set(b)
        w_out_t = w_out_t.at[lo:lo + hid_c, :out_c].set(
            params["W_out"][:, hd * hid_c:(hd + 1) * hid_c].T)
    b_out = jnp.zeros((1, out_pad), jnp.float32).at[0, :out_c].set(params["b_out"])

    out = gat_subnet(x, graph.astype(jnp.float32), w_heads_t, b_heads, w_out_t, b_out,
                     n_heads=n_heads, hid_pad=hid_pad)
    return out[:, :, :out_c][:, :, None, :]                   # drop lane padding, .unsqueeze(2)


if __name__ == "__main__":
    # Small shapes consistent with the module's forward:
    B, N, T, C = 2, 16, 4, 2          # flow_x: (B, N, T, C) -> in_c = T*C = 8
    in_c = T * C
    hid_c, out_c, n_heads = 16, 4, 2

    key = jax.random.PRNGKey(0)
    k_flow, k_graph, k_param = jax.random.split(key, 3)

    flow_x = jax.random.normal(k_flow, (B, N, T, C), dtype=jnp.float32)
    # deterministic 0/1 adjacency with self-loops
    adj = (jax.random.uniform(k_graph, (N, N)) < 0.3).astype(jnp.float32)
    graph = jnp.clip(adj + jnp.eye(N, dtype=jnp.float32), 0.0, 1.0)

    params = init_gat_params(k_param, in_c, hid_c, out_c, n_heads)

    fwd = jax.jit(gat_net_forward)
    prediction = fwd(flow_x, graph, params)
    jax.block_until_ready(prediction)
    assert prediction.shape == (B, N, 1, out_c)
    print("KERNEL_OK")
</pallas_src>

<mosaic_0001>
module attributes {stable_mosaic.version = 11 : i64} {
  func.func @_gat_fused_kernel(%arg0: i32, %arg1: memref<1x16x8xf32, #tpu.memory_space<vmem>>, %arg2: memref<16x16xf32, #tpu.memory_space<vmem>>, %arg3: memref<8x256xf32, #tpu.memory_space<vmem>>, %arg4: memref<1x256xf32, #tpu.memory_space<vmem>>, %arg5: memref<256x128xf32, #tpu.memory_space<vmem>>, %arg6: memref<1x128xf32, #tpu.memory_space<vmem>>, %arg7: memref<1x16x128xf32, #tpu.memory_space<vmem>>) attributes {dimension_semantics = [#tpu.dimension_semantics<parallel>], iteration_bounds = array<i64: 2>, scalar_prefetch = 0 : i64, scratch_operands = 0 : i64, tpu.core_type = #tpu.core_type<tc>, window_params = [{transform_indices = @transform_0, window_bounds = array<i64: 1, 16, 8>}, {pipeline_mode = #tpu.pipeline_mode<synchronous>, transform_indices = @transform_1, window_bounds = array<i64: 16, 16>}, {pipeline_mode = #tpu.pipeline_mode<synchronous>, transform_indices = @transform_2, window_bounds = array<i64: 8, 256>}, {pipeline_mode = #tpu.pipeline_mode<synchronous>, transform_indices = @transform_3, window_bounds = array<i64: 1, 256>}, {pipeline_mode = #tpu.pipeline_mode<synchronous>, transform_indices = @transform_4, window_bounds = array<i64: 256, 128>}, {pipeline_mode = #tpu.pipeline_mode<synchronous>, transform_indices = @transform_5, window_bounds = array<i64: 1, 128>}, {transform_indices = @transform_6, window_bounds = array<i64: 1, 16, 128>}]} {
    %c0 = arith.constant 0 : index
    %c0_0 = arith.constant 0 : index
    %c0_1 = arith.constant 0 : index
    %0 = vector.load %arg1[%c0, %c0_0, %c0_1] : memref<1x16x8xf32, #tpu.memory_space<vmem>>, vector<1x16x8xf32>
    %1 = vector.shape_cast %0 : vector<1x16x8xf32> to vector<16x8xf32>
    %c0_2 = arith.constant 0 : index
    %c0_3 = arith.constant 0 : index
    %2 = vector.load %arg2[%c0_2, %c0_3] : memref<16x16xf32, #tpu.memory_space<vmem>>, vector<16x16xf32>
    %c0_4 = arith.constant 0 : index
    %c0_5 = arith.constant 0 : index
    %3 = vector.load %arg3[%c0_4, %c0_5] : memref<8x256xf32, #tpu.memory_space<vmem>>, vector<8x256xf32>
    %cst = arith.constant dense<0.000000e+00> : vector<16x256xf32>
    %4 = tpu.matmul %1, %3, %cst {dimension_numbers = #tpu.dot_dimension_numbers<[1], [0], [0], [1], [0, 0, 1, 1], [], []>} : vector<16x8xf32>, vector<8x256xf32>, vector<16x256xf32> -> vector<16x256xf32>
    %cst_6 = arith.constant 0.000000e+00 : f32
    %5 = vector.broadcast %cst_6 : f32 to vector<16x128xf32>
    %6 = vector.extract_strided_slice %4 {offsets = [0, 0], sizes = [16, 128], strides = [1, 1]} : vector<16x256xf32> to vector<16x128xf32>
    %cst_7 = arith.constant dense<0.000000e+00> : vector<16x16xf32>
    %7 = tpu.matmul %6, %6, %cst_7 {dimension_numbers = #tpu.dot_dimension_numbers<[1], [1], [0], [0], [0, 0, 1, 0], [], []>} : vector<16x128xf32>, vector<16x128xf32>, vector<16x16xf32> -> vector<16x16xf32>
    %8 = arith.mulf %7, %2 : vector<16x16xf32>
    %cst_8 = arith.constant 0.000000e+00 : f32
    %9 = vector.broadcast %cst_8 : f32 to vector<16x16xf32>
    %10 = arith.cmpf oeq, %8, %9 : vector<16x16xf32>
    %cst_9 = arith.constant -1.000000e+16 : f32
    %11 = vector.broadcast %cst_9 : f32 to vector<16x16xf32>
    %12 = arith.select %10, %11, %8 : vector<16x16xi1>, vector<16x16xf32>
    %cst_10 = arith.constant dense<0xFF800000> : vector<16xf32>
    %13 = vector.multi_reduction <maximumf>, %12, %cst_10 [1] : vector<16x16xf32> to vector<16xf32>
    %14 = vector.shape_cast %13 : vector<16xf32> to vector<16x1xf32>
    %15 = vector.broadcast %14 : vector<16x1xf32> to vector<16x16xf32>
    %16 = arith.subf %12, %15 : vector<16x16xf32>
    %17 = math.exp %16 : vector<16x16xf32>
    %cst_11 = arith.constant dense<0.000000e+00> : vector<16xf32>
    %18 = vector.multi_reduction <add>, %17, %cst_11 [1] : vector<16x16xf32> to vector<16xf32>
    %19 = vector.shape_cast %18 : vector<16xf32> to vector<16x1xf32>
    %20 = tpu.reciprocal %19 {approx = true} : vector<16x1xf32> -> vector<16x1xf32>
    %21 = vector.broadcast %20 : vector<16x1xf32> to vector<16x16xf32>
    %22 = arith.mulf %17, %21 : vector<16x16xf32>
    %cst_12 = arith.constant dense<0.000000e+00> : vector<16x128xf32>
    %23 = tpu.matmul %22, %6, %cst_12 {dimension_numbers = #tpu.dot_dimension_numbers<[1], [0], [0], [1], [0, 0, 1, 1], [], []>} : vector<16x16xf32>, vector<16x128xf32>, vector<16x128xf32> -> vector<16x128xf32>
    %c0_13 = arith.constant 0 : index
    %c0_14 = arith.constant 0 : index
    %24 = vector.load %arg4[%c0_13, %c0_14] : memref<1x256xf32, #tpu.memory_space<vmem>>, vector<1x128xf32>
    %25 = vector.broadcast %24 : vector<1x128xf32> to vector<16x128xf32>
    %26 = arith.addf %23, %25 : vector<16x128xf32>
    %cst_15 = arith.constant 0.000000e+00 : f32
    %27 = vector.broadcast %cst_15 : f32 to vector<16x128xf32>
    %28 = arith.cmpf oge, %26, %27 : vector<16x128xf32>
    %cst_16 = arith.constant 0.00999999977 : f32
    %29 = vector.broadcast %cst_16 : f32 to vector<16x128xf32>
    %30 = arith.mulf %29, %26 : vector<16x128xf32>
    %31 = arith.select %28, %26, %30 : vector<16x128xi1>, vector<16x128xf32>
    %c0_17 = arith.constant 0 : index
    %c0_18 = arith.constant 0 : index
    %32 = vector.load %arg5[%c0_17, %c0_18] : memref<256x128xf32, #tpu.memory_space<vmem>>, vector<128x128xf32>
    %cst_19 = arith.constant dense<0.000000e+00> : vector<16x128xf32>
    %33 = tpu.matmul %31, %32, %cst_19 {dimension_numbers = #tpu.dot_dimension_numbers<[1], [0], [0], [1], [0, 0, 1, 1], [], []>} : vector<16x128xf32>, vector<128x128xf32>, vector<16x128xf32> -> vector<16x128xf32>
    %34 = arith.addf %5, %33 : vector<16x128xf32>
    %35 = vector.extract_strided_slice %4 {offsets = [0, 128], sizes = [16, 128], strides = [1, 1]} : vector<16x256xf32> to vector<16x128xf32>
    %cst_20 = arith.constant dense<0.000000e+00> : vector<16x16xf32>
    %36 = tpu.matmul %35, %35, %cst_20 {dimension_numbers = #tpu.dot_dimension_numbers<[1], [1], [0], [0], [0, 0, 1, 0], [], []>} : vector<16x128xf32>, vector<16x128xf32>, vector<16x16xf32> -> vector<16x16xf32>
    %37 = arith.mulf %36, %2 : vector<16x16xf32>
    %cst_21 = arith.constant 0.000000e+00 : f32
    %38 = vector.broadcast %cst_21 : f32 to vector<16x16xf32>
    %39 = arith.cmpf oeq, %37, %38 : vector<16x16xf32>
    %cst_22 = arith.constant -1.000000e+16 : f32
    %40 = vector.broadcast %cst_22 : f32 to vector<16x16xf32>
    %41 = arith.select %39, %40, %37 : vector<16x16xi1>, vector<16x16xf32>
    %cst_23 = arith.constant dense<0xFF800000> : vector<16xf32>
    %42 = vector.multi_reduction <maximumf>, %41, %cst_23 [1] : vector<16x16xf32> to vector<16xf32>
    %43 = vector.shape_cast %42 : vector<16xf32> to vector<16x1xf32>
    %44 = vector.broadcast %43 : vector<16x1xf32> to vector<16x16xf32>
    %45 = arith.subf %41, %44 : vector<16x16xf32>
    %46 = math.exp %45 : vector<16x16xf32>
    %cst_24 = arith.constant dense<0.000000e+00> : vector<16xf32>
    %47 = vector.multi_reduction <add>, %46, %cst_24 [1] : vector<16x16xf32> to vector<16xf32>
    %48 = vector.shape_cast %47 : vector<16xf32> to vector<16x1xf32>
    %49 = tpu.reciprocal %48 {approx = true} : vector<16x1xf32> -> vector<16x1xf32>
    %50 = vector.broadcast %49 : vector<16x1xf32> to vector<16x16xf32>
    %51 = arith.mulf %46, %50 : vector<16x16xf32>
    %cst_25 = arith.constant dense<0.000000e+00> : vector<16x128xf32>
    %52 = tpu.matmul %51, %35, %cst_25 {dimension_numbers = #tpu.dot_dimension_numbers<[1], [0], [0], [1], [0, 0, 1, 1], [], []>} : vector<16x16xf32>, vector<16x128xf32>, vector<16x128xf32> -> vector<16x128xf32>
    %c0_26 = arith.constant 0 : index
    %c128 = arith.constant 128 : index
    %53 = vector.load %arg4[%c0_26, %c128] : memref<1x256xf32, #tpu.memory_space<vmem>>, vector<1x128xf32>
    %54 = vector.broadcast %53 : vector<1x128xf32> to vector<16x128xf32>
    %55 = arith.addf %52, %54 : vector<16x128xf32>
    %cst_27 = arith.constant 0.000000e+00 : f32
    %56 = vector.broadcast %cst_27 : f32 to vector<16x128xf32>
    %57 = arith.cmpf oge, %55, %56 : vector<16x128xf32>
    %cst_28 = arith.constant 0.00999999977 : f32
    %58 = vector.broadcast %cst_28 : f32 to vector<16x128xf32>
    %59 = arith.mulf %58, %55 : vector<16x128xf32>
    %60 = arith.select %57, %55, %59 : vector<16x128xi1>, vector<16x128xf32>
    %c128_29 = arith.constant 128 : index
    %c0_30 = arith.constant 0 : index
    %61 = vector.load %arg5[%c128_29, %c0_30] : memref<256x128xf32, #tpu.memory_space<vmem>>, vector<128x128xf32>
    %cst_31 = arith.constant dense<0.000000e+00> : vector<16x128xf32>
    %62 = tpu.matmul %60, %61, %cst_31 {dimension_numbers = #tpu.dot_dimension_numbers<[1], [0], [0], [1], [0, 0, 1, 1], [], []>} : vector<16x128xf32>, vector<128x128xf32>, vector<16x128xf32> -> vector<16x128xf32>
    %63 = arith.addf %34, %62 : vector<16x128xf32>
    %cst_32 = arith.constant dense<0.000000e+00> : vector<16x16xf32>
    %64 = tpu.matmul %63, %63, %cst_32 {dimension_numbers = #tpu.dot_dimension_numbers<[1], [1], [0], [0], [0, 0, 1, 0], [], []>} : vector<16x128xf32>, vector<16x128xf32>, vector<16x16xf32> -> vector<16x16xf32>
    %65 = arith.mulf %64, %2 : vector<16x16xf32>
    %cst_33 = arith.constant 0.000000e+00 : f32
    %66 = vector.broadcast %cst_33 : f32 to vector<16x16xf32>
    %67 = arith.cmpf oeq, %65, %66 : vector<16x16xf32>
    %cst_34 = arith.constant -1.000000e+16 : f32
    %68 = vector.broadcast %cst_34 : f32 to vector<16x16xf32>
    %69 = arith.select %67, %68, %65 : vector<16x16xi1>, vector<16x16xf32>
    %cst_35 = arith.constant dense<0xFF800000> : vector<16xf32>
    %70 = vector.multi_reduction <maximumf>, %69, %cst_35 [1] : vector<16x16xf32> to vector<16xf32>
    %71 = vector.shape_cast %70 : vector<16xf32> to vector<16x1xf32>
    %72 = vector.broadcast %71 : vector<16x1xf32> to vector<16x16xf32>
    %73 = arith.subf %69, %72 : vector<16x16xf32>
    %74 = math.exp %73 : vector<16x16xf32>
    %cst_36 = arith.constant dense<0.000000e+00> : vector<16xf32>
    %75 = vector.multi_reduction <add>, %74, %cst_36 [1] : vector<16x16xf32> to vector<16xf32>
    %76 = vector.shape_cast %75 : vector<16xf32> to vector<16x1xf32>
    %77 = tpu.reciprocal %76 {approx = true} : vector<16x1xf32> -> vector<16x1xf32>
    %78 = vector.broadcast %77 : vector<16x1xf32> to vector<16x16xf32>
    %79 = arith.mulf %74, %78 : vector<16x16xf32>
    %cst_37 = arith.constant dense<0.000000e+00> : vector<16x128xf32>
    %80 = tpu.matmul %79, %63, %cst_37 {dimension_numbers = #tpu.dot_dimension_numbers<[1], [0], [0], [1], [0, 0, 1, 1], [], []>} : vector<16x16xf32>, vector<16x128xf32>, vector<16x128xf32> -> vector<16x128xf32>
    %c0_38 = arith.constant 0 : index
    %c0_39 = arith.constant 0 : index
    %81 = vector.load %arg6[%c0_38, %c0_39] : memref<1x128xf32, #tpu.memory_space<vmem>>, vector<1x128xf32>
    %82 = vector.broadcast %81 : vector<1x128xf32> to vector<16x128xf32>
    %83 = arith.addf %80, %82 : vector<16x128xf32>
    %cst_40 = arith.constant 0.000000e+00 : f32
    %84 = vector.broadcast %cst_40 : f32 to vector<16x128xf32>
    %85 = arith.cmpf oge, %83, %84 : vector<16x128xf32>
    %cst_41 = arith.constant 0.00999999977 : f32
    %86 = vector.broadcast %cst_41 : f32 to vector<16x128xf32>
    %87 = arith.mulf %86, %83 : vector<16x128xf32>
    %88 = arith.select %85, %83, %87 : vector<16x128xi1>, vector<16x128xf32>
    %c0_42 = arith.constant 0 : index
    %c0_43 = arith.constant 0 : index
    %c0_44 = arith.constant 0 : index
    %89 = vector.load %arg7[%c0_42, %c0_43, %c0_44] : memref<1x16x128xf32, #tpu.memory_space<vmem>>, vector<1x16x128xf32>
    %90 = vector.shape_cast %89 : vector<1x16x128xf32> to vector<16x128xf32>
    %91 = vector.shape_cast %88 : vector<16x128xf32> to vector<1x16x128xf32>
    tpu.vector_store %arg7[%c0_42, %c0_43, %c0_44], %91 {strides = array<i32>} : memref<1x16x128xf32, #tpu.memory_space<vmem>>, vector<1x16x128xf32>,
    return
  }
  func.func @transform_0(%arg0: i32) -> (i32, i32, i32) {
    %c0_i32 = arith.constant 0 : i32
    %c0_i32_0 = arith.constant 0 : i32
    %c0_i32_1 = arith.constant 0 : i32
    return %arg0, %c0_i32, %c0_i32_0 : i32, i32, i32
  }
  func.func @transform_1(%arg0: i32) -> (i32, i32) {
    %c0_i32 = arith.constant 0 : i32
    %c0_i32_0 = arith.constant 0 : i32
    %c0_i32_1 = arith.constant 0 : i32
    return %c0_i32, %c0_i32_0 : i32, i32
  }
  func.func @transform_2(%arg0: i32) -> (i32, i32) {
    %c0_i32 = arith.constant 0 : i32
    %c0_i32_0 = arith.constant 0 : i32
    %c0_i32_1 = arith.constant 0 : i32
    return %c0_i32, %c0_i32_0 : i32, i32
  }
  func.func @transform_3(%arg0: i32) -> (i32, i32) {
    %c0_i32 = arith.constant 0 : i32
    %c0_i32_0 = arith.constant 0 : i32
    %c0_i32_1 = arith.constant 0 : i32
    return %c0_i32, %c0_i32_0 : i32, i32
  }
  func.func @transform_4(%arg0: i32) -> (i32, i32) {
    %c0_i32 = arith.constant 0 : i32
    %c0_i32_0 = arith.constant 0 : i32
    %c0_i32_1 = arith.constant 0 : i32
    return %c0_i32, %c0_i32_0 : i32, i32
  }
  func.func @transform_5(%arg0: i32) -> (i32, i32) {
    %c0_i32 = arith.constant 0 : i32
    %c0_i32_0 = arith.constant 0 : i32
    %c0_i32_1 = arith.constant 0 : i32
    return %c0_i32, %c0_i32_0 : i32, i32
  }
  func.func @transform_6(%arg0: i32) -> (i32, i32, i32) {
    %c0_i32 = arith.constant 0 : i32
    %c0_i32_0 = arith.constant 0 : i32
    %c0_i32_1 = arith.constant 0 : i32
    return %arg0, %c0_i32, %c0_i32_0 : i32, i32, i32
  }
}

</mosaic_0001>

<bundles_post_ra>
// kernel: gat_net_forward.1
= control target key start
LH: loop header
LB: loop body
LE: loop exit
PB: predicated region body
PF: predicated region fallthrough
CT: control target
= control target key end

     0   :  { %s1446_s21 = smov 0   ;;  %s1629_s0 = inlined_call_operand.vmem [shape: f32[2,16,8], index: 0, kind: input, shape index: {}]   ;;  %s1630_s1 = inlined_call_operand.vmem [shape: f32[16,16], index: 1, kind: input, shape index: {}]   ;;  %s1631_s2 = inlined_call_operand.vmem [shape: f32[8,256], index: 2, kind: input, shape index: {}]   ;;  %s1632_s3 = inlined_call_operand.vmem [shape: f32[1,256], index: 3, kind: input, shape index: {}]   ;;  %s1633_s4 = inlined_call_operand.vmem [shape: f32[256,128], index: 4, kind: input, shape index: {}]   ;;  %s1634_s5 = inlined_call_operand.vmem [shape: f32[1,128], index: 5, kind: input, shape index: {}]   ;;  %s1635_s6 = inlined_call_operand.vmem [shape: f32[2,16,128], index: 6, kind: output, shape index: {}]  }
   0x1 LB: > { %s1173_s22 = sadd.s32 4294967295, %s1408_s21   ;;  %p1177_p0 = scmp.ge.s32.totalorder %s1408_s21, 1  ;;  %s1408_s21 = sphi %s1446_s21, %s16_s21  }
   0x2   : > { %p212_p1 = scmp.lt.s32.totalorder %s1408_s21, 3 }
   0x4   : > { %p213_p2 = pnand %p1177_p0, %p212_p1 }
   0x5   : > { %p242_p3 = scmp.lt.s32.totalorder (!%p213_p2), %s1173_s22, 1 }
   0x6   : > { %216 = sbr.rel (%p213_p2) target bundleno = 1860 (0x744), region = 44 }
   0xb   : > { %v257_v0 = vld [vmem:[%s1631_s2 + $0x8] sm:$0xff]  ;;  %v256_v1 = vld [vmem:[%s1631_s2] sm:$0xff]  ;;  %v1410_v2 = vmov 0.0   ;;  %s1637_s22 = smov (!%p242_p3, %s1173_s22), 1  ;;  %vm258_vm0 = vcmask 64512   ;;  %vm423_vm3 = vcmask 130048  }
   0xc   : > { %295 = vmatprep.subr.mxu0 %v257_v0  ;;  %329 = vmatprep.mubr.f32.mxu0 %v1410_v2  ;;  %s1195_s27 = sshll.u32 %s1637_s22, 4  ;;  %v1482_v9 = vld [vmem:[%s1630_s1 + $0x8] sm:$0xff]  ;;  %v1487_v11 = vld [vmem:[%s1630_s1] sm:$0xff]  ;;  %v555_v47 = vld [vmem:[%s1633_s4 + $0x78] sm:$0xff] }
   0xd   : > { %296 = vmatpush1.msra.mxu0 %v256_v1  ;;  %s246_s30 = scalar_lea.vmem %s1629_s0, %s1195_s27  ;;  %v554_v48 = vld [vmem:[%s1633_s4 + $0x70] sm:$0xff]  ;;  %v553_v49 = vld [vmem:[%s1633_s4 + $0x68] sm:$0xff]  ;;  %v552_v50 = vld [vmem:[%s1633_s4 + $0x60] sm:$0xff]  ;;  %s251_s20 = scalar_lea.vmem %s1635_s6, %s1195_s27 }
   0xe   : > { %v252_v3 = vld [vmem:[%s246_s30] sm:$0xff]  ;;  %v253_v4 = vld [vmem:[%s246_s30 + $0x8] sm:$0xff]  ;;  %v551_v51 = vld [vmem:[%s1633_s4 + $0x58] sm:$0xff] }
   0xf   : > { %1182 = vmatmul.mubr.msk.f32.vlgmr.msra.gmra.mxu0 %vm258_vm0, %v252_v3  ;;  %v550_v52 = vld [vmem:[%s1633_s4 + $0x50] sm:$0xff]  ;;  %v549_v53 = vld [vmem:[%s1633_s4 + $0x48] sm:$0xff]  ;;  %v548_v54 = vld [vmem:[%s1633_s4 + $0x40] sm:$0xff] }
  0x10   : > { %335 = vmatprep.mubr.f32.mxu0 %v1410_v2  ;;  %v547_v55 = vld [vmem:[%s1633_s4 + $0x38] sm:$0xff]  ;;  %v546_v56 = vld [vmem:[%s1633_s4 + $0x30] sm:$0xff]  ;;  %v545_v57 = vld [vmem:[%s1633_s4 + $0x28] sm:$0xff] }
  0x11   : > { %v544_v58 = vld [vmem:[%s1633_s4 + $0x20] sm:$0xff] }
  0x13   : > { %1183 = vmatmul.mubr.msk.f32.gmra.mxu0 %vm258_vm0, %v253_v4  ;;  %v768_v4 = vld [vmem:[%s1633_s4 + $0xf8] sm:$0xff] }
  0xcf   : > { %v331_v5 = vpop.f32.mrf.mxu0 }
  0xd0   : > { %1261 = vmatprep.mubr.f32.mxu1 %v331_v5 }
  0xd1   : > { %v1468_v6 = vpop.f32.mrf.mxu0 }
  0xd3   : > { %v337_v7 = vpop.f32.mrf.mxu0 }
  0xd4   : > { %1257 = vmatprep.subr.mxu1 %v337_v7  ;;  %1264 = vmatprep.subr.mxu0 %v337_v7 }
  0xd5   : > { %1258 = vmatpush3.xpose.msra.mxu1 %v337_v7  ;;  %1265 = vmatpush3.msra.mxu0 %v337_v7  ;;  %v1470_v8 = vpop.f32.mrf.mxu0 }
  0xd6   : > { %1259 = vmatprep.subr.mxu1 %v331_v5  ;;  %1266 = vmatprep.subr.mxu0 %v331_v5 }
  0xd7   : > { %1267 = vmatpush3.msra.mxu0 %v331_v5 }
  0xd8   : > { %1278 = vmatprep.subr.mxu0 %v1470_v8 }
  0xd9   : > { %1260 = vmatpush3.xpose.msra.mxu1 %v331_v5 }
  0xda   : > { %1271 = vmatprep.subr.mxu1 %v1470_v8 }
  0xdc   : > { %1262 = vmatmul.mubr.f32.vlgmr.msra.gmra.mxu1 %v337_v7 }
  0xdd   : > { %1272 = vmatpush3.xpose.msra.mxu1 %v1470_v8  ;;  %1275 = vmatprep.mubr.f32.mxu1 %v1468_v6 }
  0xde   : > { %1273 = vmatprep.subr.mxu1 %v1468_v6 }
  0xe1   : > { %1274 = vmatpush3.xpose.msra.mxu1 %v1468_v6 }
  0xe2   : > { %1320 = vmatprep.subr.mxu1 %v555_v47 }
  0xe4   : > { %1276 = vmatmul.mubr.f32.vlgmr.msra.gmra.mxu1 %v1470_v8 }
  0xe5   : > { %1321 = vmatpush3.msra.mxu1 %v555_v47 }
  0xe6   : > { %1322 = vmatprep.subr.mxu1 %v554_v48 }
  0xe7   : > { %1323 = vmatpush3.msra.mxu1 %v554_v48 }
  0xe8   : > { %1324 = vmatprep.subr.mxu1 %v553_v49 }
  0xe9   : > { %1325 = vmatpush3.msra.mxu1 %v553_v49 }
  0xea   : > { %1326 = vmatprep.subr.mxu1 %v552_v50 }
  0xeb   : > { %1327 = vmatpush3.msra.mxu1 %v552_v50 }
  0xec   : > { %1328 = vmatprep.subr.mxu1 %v551_v51 }
  0xed   : > { %1329 = vmatpush3.msra.mxu1 %v551_v51 }
  0xee   : > { %1330 = vmatprep.subr.mxu1 %v550_v52 }
  0xef   : > { %1331 = vmatpush3.msra.mxu1 %v550_v52 }
  0xf0   : > { %1332 = vmatprep.subr.mxu1 %v549_v53 }
  0xf1   : > { %1333 = vmatpush3.msra.mxu1 %v549_v53 }
  0xf2   : > { %1334 = vmatprep.subr.mxu1 %v548_v54 }
  0xf3   : > { %1335 = vmatpush3.msra.mxu1 %v548_v54 }
  0xf4   : > { %1336 = vmatprep.subr.mxu1 %v547_v55 }
  0xf5   : > { %1337 = vmatpush3.msra.mxu1 %v547_v55 }
  0xf6   : > { %1338 = vmatprep.subr.mxu1 %v546_v56 }
  0xf7   : > { %1339 = vmatpush3.msra.mxu1 %v546_v56 }
  0xf8   : > { %1340 = vmatprep.subr.mxu1 %v545_v57 }
  0xf9   : > { %1341 = vmatpush3.msra.mxu1 %v545_v57 }
  0xfa   : > { %1342 = vmatprep.subr.mxu1 %v544_v58 }
  0xfb   : > { %1343 = vmatpush3.msra.mxu1 %v544_v58 }
 0x19c   : > { %v1263_v10 = vpop.f32.mrf.mxu1 }
 0x19d   : > { %v418_v12 = vmul.f32 %v1263_v10, %v1482_v9 }
 0x19e   : > { %v408_v13 = vpop.f32.mrf.mxu1 }
 0x19f   : > { %v417_v14 = vmul.f32 %v408_v13, %v1487_v11  ;;  %vm420_vm2 = vcmp.eq.f32.partialorder %v418_v12, 0.0  ;;  %v764_v13 = vld [vmem:[%s1633_s4 + $0xd8] sm:$0xff] }
 0x1a0   : > { %v422_v18 = vsel %vm420_vm2, -1e+16, %v418_v12  ;;  %v767_v12 = vld [vmem:[%s1633_s4 + $0xf0] sm:$0xff] }
 0x1a1   : > { %vm419_vm1 = vcmp.eq.f32.partialorder %v417_v14, 0.0  ;;  %v427_v22 = vsel %vm423_vm3, %v422_v18, -inf }
 0x1a2   : > { %v421_v15 = vsel %vm419_vm1, -1e+16, %v417_v14  ;;  %v763_v14 = vld [vmem:[%s1633_s4 + $0xd0] sm:$0xff] }
 0x1a3   : > { %v424_v16 = vsel %vm423_vm3, %v421_v15, -inf }
 0x1a4   : > { %425 = vmax.xlane.f32.xlu0 %v424_v16  ;;  %v1277_v17 = vpop.f32.mrf.mxu1  ;;  %v761_v16 = vld [vmem:[%s1633_s4 + $0xc0] sm:$0xff] }
 0x1a5   : > { %v632_v19 = vmul.f32 %v1277_v17, %v1482_v9  ;;  %v760_v17 = vld [vmem:[%s1633_s4 + $0xb8] sm:$0xff] }
 0x1a6   : > { %v622_v20 = vpop.f32.mrf.mxu1 }
 0x1a7   : > { %v631_v21 = vmul.f32 %v622_v20, %v1487_v11  ;;  %vm634_vm5 = vcmp.eq.f32.partialorder %v632_v19, 0.0  ;;  %v542_v20 = vld [vmem:[%s1633_s4 + $0x10] sm:$0xff] }
 0x1a8   : > { %428 = vmax.xlane.f32.xlu0 %v427_v22  ;;  %v636_v25 = vsel %vm634_vm5, -1e+16, %v632_v19  ;;  %v759_v19 = vld [vmem:[%s1633_s4 + $0xb0] sm:$0xff]  ;;  %v541_v22 = vld [vmem:[%s1633_s4 + $0x8] sm:$0xff] }
 0x1a9   : > { %vm633_vm4 = vcmp.eq.f32.partialorder %v631_v21, 0.0  ;;  %v640_v26 = vsel %vm423_vm3, %v636_v25, -inf }
 0x1aa   : > { %v635_v23 = vsel %vm633_vm4, -1e+16, %v631_v21  ;;  %v758_v21 = vld [vmem:[%s1633_s4 + $0xa8] sm:$0xff] }
 0x1ab   : > { %v637_v24 = vsel %vm423_vm3, %v635_v23, -inf }
 0x1ac   : > { %638 = vmax.xlane.f32.xlu1 %v637_v24  ;;  %v540_v24 = vld [vmem:[%s1633_s4] sm:$0xff] }
 0x1b0   : > { %641 = vmax.xlane.f32.xlu1 %v640_v26  ;;  %v755_v26 = vld [vmem:[%s1633_s4 + $0x90] sm:$0xff] }
 0x22d   : > { %v426_v27 = vpop.xlane.xlu0 %425 }
 0x22e   : > { %v430_v28 = vsub.f32 %v421_v15, %v426_v27  ;;  %v762_v15 = vld [vmem:[%s1633_s4 + $0xc8] sm:$0xff] }
 0x22f   : > { %v754_v27 = vld [vmem:[%s1633_s4 + $0x88] sm:$0xff] }
 0x230   : > { %v432_v29 = vmul.f32 1.442695, %v430_v28  ;;  %v753_v28 = vld [vmem:[%s1633_s4 + $0x80] sm:$0xff] }
 0x231   : > { %v429_v30 = vpop.xlane.xlu0 %428 }
 0x232   : > { %1378 = vpow2.f32 %v432_v29  ;;  %v431_v31 = vsub.f32 %v422_v18, %v429_v30  ;;  %v543_v18 = vld [vmem:[%s1633_s4 + $0x18] sm:$0xff]  ;;  %v1184_v29 = vld [vmem:[%s1632_s3] ss:$0 sm:$0xff] }
 0x233   : > { %1344 = vmatprep.subr.mxu1 %v543_v18 }
 0x234   : > { %v434_v32 = vmul.f32 1.442695, %v431_v31  ;;  %1345 = vmatpush3.msra.mxu1 %v543_v18 }
 0x235   : > { %v639_v33 = vpop.xlane.xlu1 %638  ;;  %1346 = vmatprep.subr.mxu1 %v542_v20 }
 0x236   : > { %1380 = vpow2.f32 %v434_v32  ;;  %v643_v34 = vsub.f32 %v635_v23, %v639_v33  ;;  %1347 = vmatpush3.msra.mxu1 %v542_v20  ;;  %v757_v23 = vld [vmem:[%s1633_s4 + $0xa0] sm:$0xff] }
 0x237   : > { %1348 = vmatprep.subr.mxu1 %v541_v22 }
 0x238   : > { %v645_v35 = vmul.f32 1.442695, %v643_v34  ;;  %1349 = vmatpush3.msra.mxu1 %v541_v22 }
 0x239   : > { %v642_v36 = vpop.xlane.xlu1 %641  ;;  %1350 = vmatprep.subr.mxu1 %v540_v24 }
 0x23a   : > { %1382 = vpow2.f32 %v645_v35  ;;  %v644_v37 = vsub.f32 %v636_v25, %v642_v36  ;;  %1351 = vmatpush3.msra.mxu1 %v540_v24  ;;  %v756_v25 = vld [vmem:[%s1633_s4 + $0x98] sm:$0xff]  ;;  %v1187_v36 = vld [vmem:[%s1632_s3 + $0x1] ss:$0 sm:$0xff] }
 0x23c   : > { %v647_v38 = vmul.f32 1.442695, %v644_v37 }
 0x23e   : > { %1384 = vpow2.f32 %v647_v38 }
 0x23f   : > { %v1379_v39 = vpop.eup %1378 }
 0x240   : > { %v436_v40 = vsel %vm423_vm3, %v1379_v39, 0.0 }
 0x241   : > { %437 = vadd.xlane.f32.xlu0 %v436_v40 }
 0x243   : > { %v1381_v41 = vpop.eup %1380 }
 0x244   : > { %v439_v42 = vsel %vm423_vm3, %v1381_v41, 0.0 }
 0x245   : > { %440 = vadd.xlane.f32.xlu1 %v439_v42 }
 0x247   : > { %v1383_v43 = vpop.eup %1382 }
 0x248   : > { %v649_v44 = vsel %vm423_vm3, %v1383_v43, 0.0 }
 0x249   : > { %650 = vadd.xlane.f32.xlu0 %v649_v44 }
 0x24b   : > { %v1385_v45 = vpop.eup %1384 }
 0x24c   : > { %v652_v46 = vsel %vm423_vm3, %v1385_v45, 0.0 }
 0x24d   : > { %653 = vadd.xlane.f32.xlu1 %v652_v46 }
 0x2ca   : > { %v438_v59 = vpop.xlane.xlu0 %437 }
 0x2cb   : > { %1386 = vrcp.f32 %v438_v59 }
 0x2ce   : > { %v441_v60 = vpop.xlane.xlu1 %440 }
 0x2cf   : > { %1388 = vrcp.f32 %v441_v60 }
 0x2d2   : > { %v651_v61 = vpop.xlane.xlu0 %650 }
 0x2d3   : > { %1390 = vrcp.f32 %v651_v61 }
 0x2d6   : > { %v654_v62 = vpop.xlane.xlu1 %653 }
 0x2d7   : > { %1392 = vrcp.f32 %v654_v62 }
 0x2d8   : > { %v1387_v63 = vpop.eup %1386 }
 0x2d9   : > { %v444_v0 = vmul.f32 %v1387_v63, %v1379_v39 }
 0x2db   : > { %1268 = vmatprep.mubr.msk.f32.mxu0 %vm423_vm3, %v444_v0 }
 0x2dc   : > { %v1389_v1 = vpop.eup %1388 }
 0x2dd   : > { %v445_v2 = vmul.f32 %v1389_v1, %v1381_v41 }
 0x2df   : > { %1269 = vmatmul.mubr.msk.f32.vlgmr.msra.gmra.mxu0 %vm423_vm3, %v445_v2 }
 0x2e0   : > { %v1391_v3 = vpop.eup %1390  ;;  %1279 = vmatpush3.msra.mxu0 %v1470_v8  ;;  %v766_v8 = vld [vmem:[%s1633_s4 + $0xe8] sm:$0xff] }
 0x2e1   : > { %1280 = vmatprep.subr.mxu0 %v1468_v6  ;;  %v657_v5 = vmul.f32 %v1391_v3, %v1383_v43 }
 0x2e2   : > { %1281 = vmatpush3.msra.mxu0 %v1468_v6  ;;  %v765_v6 = vld [vmem:[%s1633_s4 + $0xe0] sm:$0xff] }
 0x2e3   : > { %1282 = vmatprep.mubr.msk.f32.mxu0 %vm423_vm3, %v657_v5  ;;  %1285 = vmatprep.subr.mxu0 %v768_v4 }
 0x2e4   : > { %v1393_v7 = vpop.eup %1392 }
 0x2e5   : > { %v658_v10 = vmul.f32 %v1393_v7, %v1385_v45 }
 0x2e7   : > { %1283 = vmatmul.mubr.msk.f32.vlgmr.msra.gmra.mxu0 %vm423_vm3, %v658_v10 }
 0x2e8   : > { %1286 = vmatpush3.msra.mxu0 %v768_v4 }
 0x2e9   : > { %1287 = vmatprep.subr.mxu0 %v767_v12 }
 0x2ea   : > { %1288 = vmatpush3.msra.mxu0 %v767_v12 }
 0x2eb   : > { %1289 = vmatprep.subr.mxu0 %v766_v8 }
 0x2ec   : > { %1290 = vmatpush3.msra.mxu0 %v766_v8 }
 0x2ed   : > { %1291 = vmatprep.subr.mxu0 %v765_v6 }
 0x2ee   : > { %1292 = vmatpush3.msra.mxu0 %v765_v6 }
 0x2ef   : > { %1293 = vmatprep.subr.mxu0 %v764_v13 }
 0x2f0   : > { %1294 = vmatpush3.msra.mxu0 %v764_v13  ;;  %v1190_v13 = vld [vmem:[%s1634_s5] ss:$0 sm:$0xff] }
 0x2f1   : > { %1295 = vmatprep.subr.mxu0 %v763_v14 }
 0x2f2   : > { %1296 = vmatpush3.msra.mxu0 %v763_v14 }
 0x2f3   : > { %1297 = vmatprep.subr.mxu0 %v762_v15 }
 0x2f4   : > { %1298 = vmatpush3.msra.mxu0 %v762_v15 }
 0x2f5   : > { %1299 = vmatprep.subr.mxu0 %v761_v16 }
 0x2f6   : > { %1300 = vmatpush3.msra.mxu0 %v761_v16 }
 0x2f7   : > { %1301 = vmatprep.subr.mxu0 %v760_v17 }
 0x2f8   : > { %1302 = vmatpush3.msra.mxu0 %v760_v17 }
 0x2f9   : > { %1303 = vmatprep.subr.mxu0 %v759_v19 }
 0x2fa   : > { %1304 = vmatpush3.msra.mxu0 %v759_v19 }
 0x2fb   : > { %1305 = vmatprep.subr.mxu0 %v758_v21 }
 0x2fc   : > { %1306 = vmatpush3.msra.mxu0 %v758_v21 }
 0x2fd   : > { %1307 = vmatprep.subr.mxu0 %v757_v23 }
 0x2fe   : > { %1308 = vmatpush3.msra.mxu0 %v757_v23 }
 0x2ff   : > { %1309 = vmatprep.subr.mxu0 %v756_v25 }
 0x300   : > { %1310 = vmatpush3.msra.mxu0 %v756_v25 }
 0x301   : > { %1311 = vmatprep.subr.mxu0 %v755_v26 }
 0x302   : > { %1312 = vmatpush3.msra.mxu0 %v755_v26 }
 0x303   : > { %1313 = vmatprep.subr.mxu0 %v754_v27 }
 0x304   : > { %1314 = vmatpush3.msra.mxu0 %v754_v27 }
 0x305   : > { %1315 = vmatprep.subr.mxu0 %v753_v28 }
 0x306   : > { %1316 = vmatpush3.msra.mxu0 %v753_v28 }
 0x39f   : > { %v1270_v30 = vpop.f32.mrf.mxu0 }
 0x3a0   : > { %v531_v31 = vadd.f32 %v1270_v30, %v1184_v29 }
 0x3a1   : > { %v525_v32 = vpop.f32.mrf.mxu0 }
 0x3a2   : > { %v526_v33 = vadd.f32 %v1184_v29, %v525_v32  ;;  %v537_v34 = vmul.f32 0.01, %v531_v31  ;;  %vm535_vm6 = vcmp.ge.f32.partialorder %v531_v31, 0.0 }
 0x3a4   : > { %v536_v35 = vmul.f32 0.01, %v526_v33  ;;  %vm534_vm7 = vcmp.ge.f32.partialorder %v526_v33, 0.0  ;;  %v539_v39 = vsel %vm535_vm6, %v531_v31, %v537_v34 }
 0x3a6   : > { %v538_v37 = vsel %vm534_vm7, %v526_v33, %v536_v35 }
 0x3a7   : > { %v1284_v38 = vpop.f32.mrf.mxu0  ;;  %1352 = vmatprep.mubr.f32.mxu1 %v538_v37 }
 0x3a8   : > { %v744_v40 = vadd.f32 %v1284_v38, %v1187_v36  ;;  %1353 = vmatmul.mubr.f32.vlgmr.msra.gmra.mxu1 %v539_v39 }
 0x3a9   : > { %v738_v41 = vpop.f32.mrf.mxu0 }
 0x3aa   : > { %v739_v42 = vadd.f32 %v1187_v36, %v738_v41  ;;  %v750_v43 = vmul.f32 0.01, %v744_v40  ;;  %vm748_vm8 = vcmp.ge.f32.partialorder %v744_v40, 0.0 }
 0x3ac   : > { %v749_v44 = vmul.f32 0.01, %v739_v42  ;;  %vm747_vm9 = vcmp.ge.f32.partialorder %v739_v42, 0.0  ;;  %v752_v46 = vsel %vm748_vm8, %v744_v40, %v750_v43 }
 0x3ae   : > { %v751_v45 = vsel %vm747_vm9, %v739_v42, %v749_v44 }
 0x3af   : > { %1317 = vmatprep.mubr.f32.mxu0 %v751_v45 }
 0x3b0   : > { %1318 = vmatmul.mubr.f32.vlgmr.msra.gmra.mxu0 %v752_v46 }
 0x468   : > { %v1354_v47 = vpop.f32.mrf.mxu1 }
 0x46a   : > { %v910_v50 = vpop.f32.mrf.mxu1 }
 0x470   : > { %v1319_v48 = vpop.f32.mrf.mxu0 }
 0x471   : > { %v916_v49 = vadd.f32 %v1354_v47, %v1319_v48 }
 0x472   : > { %v835_v51 = vpop.f32.mrf.mxu0 }
 0x473   : > { %v911_v52 = vadd.f32 %v910_v50, %v835_v51  ;;  %1355 = vmatprep.subr.mxu0 %v916_v49  ;;  %1362 = vmatprep.subr.mxu1 %v916_v49 }
 0x474   : > { %1356 = vmatpush3.xpose.msra.mxu0 %v916_v49  ;;  %1363 = vmatpush3.msra.mxu1 %v916_v49 }
 0x475   : > { %1357 = vmatprep.subr.mxu0 %v911_v52  ;;  %1359 = vmatprep.mubr.f32.mxu0 %v911_v52 }
 0x476   : > { %1364 = vmatprep.subr.mxu1 %v911_v52 }
 0x477   : > { %1365 = vmatpush3.msra.mxu1 %v911_v52 }
 0x478   : > { %1358 = vmatpush3.xpose.msra.mxu0 %v911_v52 }
 0x47b   : > { %1360 = vmatmul.mubr.f32.vlgmr.msra.gmra.mxu0 %v916_v49 }
 0x53b   : > { %v1361_v53 = vpop.f32.mrf.mxu0 }
 0x53c   : > { %v995_v54 = vmul.f32 %v1361_v53, %v1482_v9 }
 0x53d   : > { %v985_v55 = vpop.f32.mrf.mxu0 }
 0x53e   : > { %v994_v56 = vmul.f32 %v985_v55, %v1487_v11  ;;  %vm997_vm10 = vcmp.eq.f32.partialorder %v995_v54, 0.0 }
 0x53f   : > { %v999_v57 = vsel %vm997_vm10, -1e+16, %v995_v54 }
 0x540   : > { %v1003_v58 = vsel %vm423_vm3, %v999_v57, -inf  ;;  %vm996_vm11 = vcmp.eq.f32.partialorder %v994_v56, 0.0 }
 0x541   : > { %1004 = vmax.xlane.f32.xlu1 %v1003_v58  ;;  %v998_v59 = vsel %vm996_vm11, -1e+16, %v994_v56 }
 0x542   : > { %v1000_v60 = vsel %vm423_vm3, %v998_v59, -inf }
 0x543   : > { %1001 = vmax.xlane.f32.xlu0 %v1000_v60 }
 0x5ca   : > { %v1005_v61 = vpop.xlane.xlu1 %1004 }
 0x5cb   : > { %v1007_v62 = vsub.f32 %v999_v57, %v1005_v61 }
 0x5cc   : > { %v1002_v63 = vpop.xlane.xlu0 %1001 }
 0x5cd   : > { %v1010_v0 = vmul.f32 1.442695, %v1007_v62  ;;  %v1006_v1 = vsub.f32 %v998_v59, %v1002_v63 }
 0x5cf   : > { %1394 = vpow2.f32 %v1010_v0  ;;  %v1008_v9 = vmul.f32 1.442695, %v1006_v1 }
 0x5d1   : > { %1396 = vpow2.f32 %v1008_v9 }
 0x5dc   : > { %v1395_v2 = vpop.eup %1394 }
 0x5dd   : > { %v1015_v11 = vsel %vm423_vm3, %v1395_v2, 0.0 }
 0x5de   : > { %v1397_v3 = vpop.eup %1396  ;;  %1016 = vadd.xlane.f32.xlu1 %v1015_v11 }
 0x5df   : > { %v1012_v4 = vsel %vm423_vm3, %v1397_v3, 0.0 }
 0x5e0   : > { %1013 = vadd.xlane.f32.xlu0 %v1012_v4 }
 0x667   : > { %v1017_v5 = vpop.xlane.xlu1 %1016 }
 0x668   : > { %1398 = vrcp.f32 %v1017_v5 }
 0x669   : > { %v1014_v7 = vpop.xlane.xlu0 %1013 }
 0x66a   : > { %1400 = vrcp.f32 %v1014_v7 }
 0x675   : > { %v1399_v10 = vpop.eup %1398 }
 0x676   : > { %v1021_v6 = vmul.f32 %v1399_v10, %v1395_v2 }
 0x677   : > { %v1401_v12 = vpop.eup %1400 }
 0x678   : > { %v1020_v8 = vmul.f32 %v1401_v12, %v1397_v3 }
 0x67a   : > { %1366 = vmatprep.mubr.msk.f32.mxu1 %vm423_vm3, %v1020_v8 }
 0x67b   : > { %1367 = vmatmul.mubr.msk.f32.vlgmr.msra.gmra.mxu1 %vm423_vm3, %v1021_v6 }
 0x73b   : > { %v1368_v14 = vpop.f32.mrf.mxu1 }
 0x73c   : > { %v1107_v15 = vadd.f32 %v1368_v14, %v1190_v13 }
 0x73d   : > { %v1101_v16 = vpop.f32.mrf.mxu1 }
 0x73e   : > { %vm1111_vm12 = vcmp.ge.f32.partialorder %v1107_v15, 0.0  ;;  %v1113_v17 = vmul.f32 0.01, %v1107_v15  ;;  %v1102_v18 = vadd.f32 %v1190_v13, %v1101_v16 }
 0x740   : > { %v1115_v19 = vsel %vm1111_vm12, %v1107_v15, %v1113_v17  ;;  %vm1110_vm13 = vcmp.ge.f32.partialorder %v1102_v18, 0.0  ;;  %v1112_v20 = vmul.f32 0.01, %v1102_v18 }
 0x741   : > { %1117 = vst [vmem:[%s251_s20 + $0x8] sm:$0xff] %v1115_v19 }
 0x742   : > { %v1114_v21 = vsel %vm1110_vm13, %v1102_v18, %v1112_v20 }
 0x743   : > { %1116 = vst [vmem:[%s251_s20] sm:$0xff] %v1114_v21 }
 0x744 PF: > { %s16_s21 = sadd.s32 1, %s1408_s21  }
 0x745   : > { %p13_p4 = scmp.ge.s32.totalorder %s16_s21, 4  }
 0x747   :  { %15 = sbr.rel (!%p13_p4) target bundleno = 1 (0x1), region = 74 }

</bundles_post_ra>
